<compile_context>
chip_gen: v6e
topology: v6e:2x2x1
jax: 0.10.0
libtpu: 0.0.40
codegen_flags: <defaults>
</compile_context>

<pallas_src>
import jax
import jax.numpy as jnp
from jax.experimental import pallas as pl
from jax.experimental.pallas import tpu as pltpu


# --------------------------------------------------------------------------- kernel ---

def _focus_conv_kernel(x_ref, w_ref, bias_ref, o_ref):
    # x_ref   : (K, TILE_M)   streamed space-to-depth tile (pixels on lanes)
    # w_ref   : (c2, K)       BN-scale-folded pointwise conv weight (resident)
    # bias_ref: (c2, 1)       folded BN bias, f32 (resident, broadcast over lanes)
    # o_ref   : (c2, TILE_M)  lane-dense output tile
    acc = jnp.dot(w_ref[...], x_ref[...], preferred_element_type=jnp.float32)
    y = acc + bias_ref[...]
    o_ref[...] = (y * jax.nn.sigmoid(y)).astype(o_ref.dtype)


# ------------------------------------------------------------------ tiling / VMEM ---

_DEFAULT_VMEM_BYTES = 64 * 1024 * 1024          # smallest per-core VMEM (v7x)
_TILE_CANDIDATES = (32768, 16384, 8192, 4096, 2048, 1024, 512, 256, 128)


def _vmem_capacity_bytes():
    try:
        info = pltpu.get_tpu_info()
        cap = getattr(info, "vmem_capacity_bytes", None)
        if cap:
            return int(cap)
    except Exception:
        pass
    return _DEFAULT_VMEM_BYTES


def _pick_tile_m(hw2, n_batch, bytes_per_col, const_bytes, vmem_budget):
    """Largest lane-aligned pixel tile whose double-buffered footprint fits the budget,
    with bounded padding waste and a preference for >= 4 total grid steps."""
    feas = [t for t in _TILE_CANDIDATES
            if 2 * t * bytes_per_col + const_bytes <= vmem_budget
            and t <= max(hw2, 128)]
    if not feas:
        return 128
    waste_cap = max(hw2 // 8, 0)

    def padded(t):
        return -(-hw2 // t) * t

    for need_steps in (True, False):
        for t in feas:                                   # descending
            waste_ok = (padded(t) - hw2 <= waste_cap) or (t == feas[-1])
            if not waste_ok:
                continue
            if need_steps and n_batch * (padded(t) // t) < 4:
                continue
            return t
    return feas[-1]


# ------------------------------------------------------------------------ wrapper ---

def _call_kernel(x_kd, w_mat, bias, *, c2, K, tile_m, hw2_pad, out_dtype,
                 vmem_limit, single_buffer_consts):
    N = x_kd.shape[0]
    grid = (N, hw2_pad // tile_m)

    x_spec = pl.BlockSpec((None, K, tile_m), lambda n, m: (n, 0, m))
    o_spec = pl.BlockSpec((None, c2, tile_m), lambda n, m: (n, 0, m))
    if single_buffer_consts:
        # Constant-index blocks: one VMEM buffer is enough (less VMEM + DMA bookkeeping).
        w_spec = pl.BlockSpec((c2, K), lambda n, m: (0, 0), pipeline_mode=pl.Buffered(1))
        b_spec = pl.BlockSpec((c2, 1), lambda n, m: (0, 0), pipeline_mode=pl.Buffered(1))
    else:
        w_spec = pl.BlockSpec((c2, K), lambda n, m: (0, 0))
        b_spec = pl.BlockSpec((c2, 1), lambda n, m: (0, 0))

    return pl.pallas_call(
        _focus_conv_kernel,
        out_shape=jax.ShapeDtypeStruct((N, c2, hw2_pad), out_dtype),
        grid_spec=pltpu.PrefetchScalarGridSpec(
            num_scalar_prefetch=0,
            grid=grid,
            in_specs=[x_spec, w_spec, b_spec],
            out_specs=o_spec,
        ),
        compiler_params=pltpu.CompilerParams(
            dimension_semantics=("parallel", "parallel"),
            vmem_limit_bytes=vmem_limit,
        ),
    )(x_kd, w_mat, bias)


def focus_forward(x, conv_w, bn_gamma, bn_beta, bn_mean, bn_var, eps=1e-5,
                  compute_dtype=jnp.bfloat16, out_dtype=jnp.float32):
    """Focus: space-to-depth + 1x1 Conv (no bias) + BatchNorm(eval) + SiLU.

    x: (N, C, H, W) NCHW f32. conv_w: (c2, 4*C, 1, 1). Returns (N, c2, H/2, W/2)
    in `out_dtype`.  `compute_dtype` is the streaming dtype for x / folded weight
    (bf16 recommended on v6e/v7x; pass float32 for bit-exactness vs. an f32 reference).
    """
    N, C, H, W = x.shape
    # PyTorch Focus truncates odd H/W via strided slicing; we assume even dims.
    assert H % 2 == 0 and W % 2 == 0, "Focus kernel assumes even H and W"
    c2 = conv_w.shape[0]
    H2, W2 = H // 2, W // 2
    K = 4 * C
    HW2 = H2 * W2

    # --- space-to-depth in a single reshape+transpose pass straight into the
    #     (N, K, HW2) kernel layout, cast to the streaming dtype as part of the same
    #     pass.  Channel order k = (ww*2 + hh)*C + c matches
    #     torch.cat([::2,::2], [1::2,::2], [::2,1::2], [1::2,1::2], dim=1).
    x_r = x.reshape(N, C, H2, 2, W2, 2)               # (n, c, h2, hh, w2, ww)
    x_kd = jnp.transpose(x_r, (0, 5, 3, 1, 2, 4))     # (n, ww, hh, c, h2, w2)
    x_kd = x_kd.reshape(N, K, HW2).astype(compute_dtype)

    # --- fold BatchNorm (eval): scale into the weight, bias stays f32.
    inv_std = 1.0 / jnp.sqrt(bn_var.astype(jnp.float32) + eps)
    scale = bn_gamma.astype(jnp.float32) * inv_std                      # (c2,)
    bias = (bn_beta.astype(jnp.float32)
            - bn_mean.astype(jnp.float32) * scale).reshape(c2, 1)       # f32
    w_mat = (conv_w.reshape(c2, K).astype(jnp.float32)
             * scale[:, None]).astype(compute_dtype)

    # --- tile selection from the per-generation VMEM capacity.
    x_itm = jnp.dtype(compute_dtype).itemsize
    o_itm = jnp.dtype(out_dtype).itemsize
    bytes_per_col = K * x_itm + c2 * o_itm
    const_bytes = 2 * (c2 * K * x_itm + c2 * 4)       # worst case: double-buffered consts
    vmem_cap = _vmem_capacity_bytes()
    tile_m = _pick_tile_m(HW2, N, bytes_per_col, const_bytes, vmem_cap // 2)

    hw2_pad = -(-HW2 // tile_m) * tile_m
    if hw2_pad != HW2:
        x_kd = jnp.pad(x_kd, ((0, 0), (0, 0), (0, hw2_pad - HW2)))

    footprint = 2 * tile_m * bytes_per_col + const_bytes
    vmem_limit = int(min(vmem_cap * 9 // 10, max(2 * footprint, 16 * 1024 * 1024)))

    kwargs = dict(c2=c2, K=K, tile_m=tile_m, hw2_pad=hw2_pad, out_dtype=out_dtype,
                  vmem_limit=vmem_limit)
    try:
        out = _call_kernel(x_kd, w_mat, bias, single_buffer_consts=True, **kwargs)
    except Exception:
        # pl.Buffered(1) not accepted on this JAX build: fall back to default buffering.
        out = _call_kernel(x_kd, w_mat, bias, single_buffer_consts=False, **kwargs)

    if hw2_pad != HW2:
        out = out[..., :HW2]
    # (N, c2, HW2) is already NCHW once reshaped — no final transpose pass.
    return out.reshape(N, c2, H2, W2)


# ---------------------------------------------------------------------- reference ---

def focus_reference(x, conv_w, bn_gamma, bn_beta, bn_mean, bn_var, eps=1e-5):
    """Pure-JAX reference of the same forward pass (NCHW, f32)."""
    x_sd = jnp.concatenate(
        [x[..., ::2, ::2], x[..., 1::2, ::2], x[..., ::2, 1::2], x[..., 1::2, 1::2]],
        axis=1,
    )
    y = jax.lax.conv_general_dilated(
        x_sd, conv_w, window_strides=(1, 1), padding="VALID",
        dimension_numbers=("NCHW", "OIHW", "NCHW"),
    )
    inv_std = 1.0 / jnp.sqrt(bn_var + eps)
    scale = (bn_gamma * inv_std)[None, :, None, None]
    bias = (bn_beta - bn_mean * bn_gamma * inv_std)[None, :, None, None]
    y = y * scale + bias
    return y * jax.nn.sigmoid(y)


# --------------------------------------------------------------------------- main ---

if __name__ == "__main__":
    def make_inputs(key, N, C, H, W, c2):
        k_x, k_w, k_g, k_b, k_m, k_v = jax.random.split(key, 6)
        x = jax.random.normal(k_x, (N, C, H, W), dtype=jnp.float32)
        conv_w = 0.1 * jax.random.normal(k_w, (c2, 4 * C, 1, 1), dtype=jnp.float32)
        bn_gamma = 1.0 + 0.1 * jax.random.normal(k_g, (c2,), dtype=jnp.float32)
        bn_beta = 0.1 * jax.random.normal(k_b, (c2,), dtype=jnp.float32)
        bn_mean = 0.05 * jax.random.normal(k_m, (c2,), dtype=jnp.float32)
        bn_var = jnp.abs(1.0 + 0.1 * jax.random.normal(k_v, (c2,), dtype=jnp.float32))
        return x, conv_w, bn_gamma, bn_beta, bn_mean, bn_var

    k1, k2 = jax.random.split(jax.random.PRNGKey(0))

    # 1) small generic shape (N=2, C=4 -> K=16, 16x16, c2=8): exercises the padded-tile path.
    args = make_inputs(k1, 2, 4, 16, 16, 8)
    ref = focus_reference(*args)

    out_f32 = jax.block_until_ready(
        focus_forward(*args, compute_dtype=jnp.float32, out_dtype=jnp.float32))
    assert out_f32.shape == (2, 8, 8, 8), out_f32.shape
    assert jnp.allclose(out_f32, ref, atol=1e-5, rtol=1e-5), \
        float(jnp.max(jnp.abs(out_f32 - ref)))

    # bf16 streaming + bf16 output (halves both dominant HBM streams on v6e/v7x).
    out_bf16 = jax.block_until_ready(
        focus_forward(*args, compute_dtype=jnp.bfloat16, out_dtype=jnp.bfloat16))
    assert out_bf16.dtype == jnp.bfloat16
    assert jnp.allclose(out_bf16.astype(jnp.float32), ref, atol=5e-2, rtol=5e-2), \
        float(jnp.max(jnp.abs(out_bf16.astype(jnp.float32) - ref)))

    # 2) CSPDarkNet-like stem channels (c1=3 -> K=12, c2=32) at a small 32x32 spatial size.
    args2 = make_inputs(k2, 1, 3, 32, 32, 32)
    ref2 = focus_reference(*args2)
    out2 = jax.block_until_ready(
        focus_forward(*args2, compute_dtype=jnp.float32, out_dtype=jnp.float32))
    assert out2.shape == (1, 32, 16, 16), out2.shape
    assert jnp.allclose(out2, ref2, atol=1e-5, rtol=1e-5), \
        float(jnp.max(jnp.abs(out2 - ref2)))

    print("KERNEL_OK")
</pallas_src>

<mosaic_0001>
module attributes {stable_mosaic.version = 11 : i64} {
  func.func @_focus_conv_kernel(%arg0: i32, %arg1: i32, %arg2: memref<1x16x128xf32, #tpu.memory_space<vmem>>, %arg3: memref<8x16xf32, #tpu.memory_space<vmem>>, %arg4: memref<8x1xf32, #tpu.memory_space<vmem>>, %arg5: memref<1x8x128xf32, #tpu.memory_space<vmem>>) attributes {dimension_semantics = [#tpu.dimension_semantics<parallel>, #tpu.dimension_semantics<parallel>], iteration_bounds = array<i64: 2, 1>, scalar_prefetch = 0 : i64, scratch_operands = 0 : i64, tpu.core_type = #tpu.core_type<tc>, window_params = [{transform_indices = @transform_0, window_bounds = array<i64: 1, 16, 128>}, {pipeline_mode = #tpu.pipeline_mode<synchronous>, transform_indices = @transform_1, window_bounds = array<i64: 8, 16>}, {pipeline_mode = #tpu.pipeline_mode<synchronous>, transform_indices = @transform_2, window_bounds = array<i64: 8, 1>}, {transform_indices = @transform_3, window_bounds = array<i64: 1, 8, 128>}]} {
    %c0 = arith.constant 0 : index
    %c0_0 = arith.constant 0 : index
    %0 = vector.load %arg3[%c0, %c0_0] : memref<8x16xf32, #tpu.memory_space<vmem>>, vector<8x16xf32>
    %c0_1 = arith.constant 0 : index
    %c0_2 = arith.constant 0 : index
    %c0_3 = arith.constant 0 : index
    %1 = vector.load %arg2[%c0_1, %c0_2, %c0_3] : memref<1x16x128xf32, #tpu.memory_space<vmem>>, vector<1x16x128xf32>
    %2 = vector.shape_cast %1 : vector<1x16x128xf32> to vector<16x128xf32>
    %cst = arith.constant dense<0.000000e+00> : vector<8x128xf32>
    %3 = tpu.matmul %0, %2, %cst {dimension_numbers = #tpu.dot_dimension_numbers<[1], [0], [0], [1], [0, 0, 1, 1], [], []>} : vector<8x16xf32>, vector<16x128xf32>, vector<8x128xf32> -> vector<8x128xf32>
    %c0_4 = arith.constant 0 : index
    %c0_5 = arith.constant 0 : index
    %4 = vector.load %arg4[%c0_4, %c0_5] : memref<8x1xf32, #tpu.memory_space<vmem>>, vector<8x1xf32>
    %5 = vector.broadcast %4 : vector<8x1xf32> to vector<8x128xf32>
    %6 = arith.addf %3, %5 : vector<8x128xf32>
    %7 = arith.negf %6 : vector<8x128xf32>
    %8 = math.exp %7 : vector<8x128xf32>
    %cst_6 = arith.constant 1.000000e+00 : f32
    %9 = vector.broadcast %cst_6 : f32 to vector<8x128xf32>
    %10 = arith.addf %9, %8 : vector<8x128xf32>
    %11 = arith.divf %9, %10 : vector<8x128xf32>
    %12 = arith.mulf %6, %11 : vector<8x128xf32>
    %c0_7 = arith.constant 0 : index
    %c0_8 = arith.constant 0 : index
    %c0_9 = arith.constant 0 : index
    %13 = vector.load %arg5[%c0_7, %c0_8, %c0_9] : memref<1x8x128xf32, #tpu.memory_space<vmem>>, vector<1x8x128xf32>
    %14 = vector.shape_cast %13 : vector<1x8x128xf32> to vector<8x128xf32>
    %15 = vector.shape_cast %12 : vector<8x128xf32> to vector<1x8x128xf32>
    tpu.vector_store %arg5[%c0_7, %c0_8, %c0_9], %15 {strides = array<i32>} : memref<1x8x128xf32, #tpu.memory_space<vmem>>, vector<1x8x128xf32>,
    return
  }
  func.func @transform_0(%arg0: i32, %arg1: i32) -> (i32, i32, i32) {
    %c0_i32 = arith.constant 0 : i32
    %c0_i32_0 = arith.constant 0 : i32
    return %arg0, %c0_i32, %arg1 : i32, i32, i32
  }
  func.func @transform_1(%arg0: i32, %arg1: i32) -> (i32, i32) {
    %c0_i32 = arith.constant 0 : i32
    %c0_i32_0 = arith.constant 0 : i32
    %c0_i32_1 = arith.constant 0 : i32
    return %c0_i32, %c0_i32_0 : i32, i32
  }
  func.func @transform_2(%arg0: i32, %arg1: i32) -> (i32, i32) {
    %c0_i32 = arith.constant 0 : i32
    %c0_i32_0 = arith.constant 0 : i32
    %c0_i32_1 = arith.constant 0 : i32
    return %c0_i32, %c0_i32_0 : i32, i32
  }
  func.func @transform_3(%arg0: i32, %arg1: i32) -> (i32, i32, i32) {
    %c0_i32 = arith.constant 0 : i32
    %c0_i32_0 = arith.constant 0 : i32
    return %arg0, %c0_i32, %arg1 : i32, i32, i32
  }
}

module attributes {stable_mosaic.version = 11 : i64} {
  func.func @_focus_conv_kernel(%arg0: i32, %arg1: i32, %arg2: memref<1x16x128xf32, #tpu.memory_space<vmem>>, %arg3: memref<8x16xf32, #tpu.memory_space<vmem>>, %arg4: memref<8x1xf32, #tpu.memory_space<vmem>>, %arg5: memref<1x8x128xf32, #tpu.memory_space<vmem>>) attributes {dimension_semantics = [#tpu.dimension_semantics<parallel>, #tpu.dimension_semantics<parallel>], iteration_bounds = array<i64: 2, 1>, scalar_prefetch = 0 : i64, scratch_operands = 0 : i64, tpu.core_type = #tpu.core_type<tc>, window_params = [{transform_indices = @transform_0, window_bounds = array<i64: 1, 16, 128>}, {pipeline_mode = #tpu.pipeline_mode<synchronous>, transform_indices = @transform_1, window_bounds = array<i64: 8, 16>}, {pipeline_mode = #tpu.pipeline_mode<synchronous>, transform_indices = @transform_2, window_bounds = array<i64: 8, 1>}, {transform_indices = @transform_3, window_bounds = array<i64: 1, 8, 128>}]} {
    %c0 = arith.constant 0 : index
    %c0_0 = arith.constant 0 : index
    %0 = vector.load %arg3[%c0, %c0_0] : memref<8x16xf32, #tpu.memory_space<vmem>>, vector<8x16xf32>
    %c0_1 = arith.constant 0 : index
    %c0_2 = arith.constant 0 : index
    %c0_3 = arith.constant 0 : index
    %1 = vector.load %arg2[%c0_1, %c0_2, %c0_3] : memref<1x16x128xf32, #tpu.memory_space<vmem>>, vector<1x16x128xf32>
    %2 = vector.shape_cast %1 : vector<1x16x128xf32> to vector<16x128xf32>
    %cst = arith.constant dense<0.000000e+00> : vector<8x128xf32>
    %3 = tpu.matmul %0, %2, %cst {dimension_numbers = #tpu.dot_dimension_numbers<[1], [0], [0], [1], [0, 0, 1, 1], [], []>} : vector<8x16xf32>, vector<16x128xf32>, vector<8x128xf32> -> vector<8x128xf32>
    %c0_4 = arith.constant 0 : index
    %c0_5 = arith.constant 0 : index
    %4 = vector.load %arg4[%c0_4, %c0_5] : memref<8x1xf32, #tpu.memory_space<vmem>>, vector<8x1xf32>
    %5 = vector.broadcast %4 : vector<8x1xf32> to vector<8x128xf32>
    %6 = arith.addf %3, %5 : vector<8x128xf32>
    %7 = arith.negf %6 : vector<8x128xf32>
    %8 = math.exp %7 : vector<8x128xf32>
    %cst_6 = arith.constant 1.000000e+00 : f32
    %9 = vector.broadcast %cst_6 : f32 to vector<8x128xf32>
    %10 = arith.addf %9, %8 : vector<8x128xf32>
    %11 = arith.divf %9, %10 : vector<8x128xf32>
    %12 = arith.mulf %6, %11 : vector<8x128xf32>
    %c0_7 = arith.constant 0 : index
    %c0_8 = arith.constant 0 : index
    %c0_9 = arith.constant 0 : index
    %13 = vector.load %arg5[%c0_7, %c0_8, %c0_9] : memref<1x8x128xf32, #tpu.memory_space<vmem>>, vector<1x8x128xf32>
    %14 = vector.shape_cast %13 : vector<1x8x128xf32> to vector<8x128xf32>
    %15 = vector.shape_cast %12 : vector<8x128xf32> to vector<1x8x128xf32>
    tpu.vector_store %arg5[%c0_7, %c0_8, %c0_9], %15 {strides = array<i32>} : memref<1x8x128xf32, #tpu.memory_space<vmem>>, vector<1x8x128xf32>,
    return
  }
  func.func @transform_0(%arg0: i32, %arg1: i32) -> (i32, i32, i32) {
    %c0_i32 = arith.constant 0 : i32
    %c0_i32_0 = arith.constant 0 : i32
    return %arg0, %c0_i32, %arg1 : i32, i32, i32
  }
  func.func @transform_1(%arg0: i32, %arg1: i32) -> (i32, i32) {
    %c0_i32 = arith.constant 0 : i32
    %c0_i32_0 = arith.constant 0 : i32
    %c0_i32_1 = arith.constant 0 : i32
    return %c0_i32, %c0_i32_0 : i32, i32
  }
  func.func @transform_2(%arg0: i32, %arg1: i32) -> (i32, i32) {
    %c0_i32 = arith.constant 0 : i32
    %c0_i32_0 = arith.constant 0 : i32
    %c0_i32_1 = arith.constant 0 : i32
    return %c0_i32, %c0_i32_0 : i32, i32
  }
  func.func @transform_3(%arg0: i32, %arg1: i32) -> (i32, i32, i32) {
    %c0_i32 = arith.constant 0 : i32
    %c0_i32_0 = arith.constant 0 : i32
    return %arg0, %c0_i32, %arg1 : i32, i32, i32
  }
}

</mosaic_0001>

<bundles_post_ra>
// kernel: tpu_custom_call.1
= control target key start
LH: loop header
LB: loop body
LE: loop exit
PB: predicated region body
PF: predicated region fallthrough
CT: control target
= control target key end

     0   :  { %8 = vsyncpa [#allocation3], 0  ;;  %s768_s0 = inlined_call_operand.hbm [shape: f32[2,16,128], index: 0, kind: input, shape index: {}]   ;;  %s769_s1 = inlined_call_operand.vmem [shape: f32[8,16], index: 1, kind: input, shape index: {}]   ;;  %s770_s2 = inlined_call_operand.vmem [shape: f32[8,1], index: 2, kind: input, shape index: {}]   ;;  %s771_s3 = inlined_call_operand.hbm [shape: f32[2,8,128], index: 3, kind: output, shape index: {}]  }
   0x1   :  { %10 = vsyncpa [#allocation3 + $0x1], 0 }
   0x2   :  { %11 = vsyncpa [#allocation4], 0 }
   0x3   :  { %13 = vsyncpa [#allocation4 + $0x1], 0  ;;  %s629_s12 = smov 0   ;;  %s631_s13 = smov 0  }
   0x4   :  { %s633_s14 = smov 0   ;;  %s635_s15 = smov 0  }
   0x5   :  { %s637_s16 = smov 0   ;;  %s639_s17 = smov 0  }
   0x6 LB: > { %s393_s18 = sadd.s32 4294967295, %s600_s17   ;;  %s394_s19 = sadd.s32 4294967294, %s600_s17   ;;  %s600_s17 = sphi %s639_s17, %s19_s17   ;;  %s596_s16 = sphi %s637_s16, %s782_s16   ;;  %s592_s15 = sphi %s635_s15, %s781_s15   ;;  %s588_s14 = sphi %s633_s14, %s780_s14   ;;  %s584_s13 = sphi %s631_s13, %s779_s13   ;;  %s580_s12 = sphi %s629_s12, %s778_s12  }
   0x7   : > { %s31_s20 = sadd.s32 1, %s596_s16  ;;  %s40_s21 = sadd.s32 1, %s588_s14 }
   0x8   : > { %p33_p0 = scmp.ge.s32.totalorder %s31_s20, 2  ;;  %p47_p1 = scmp.ne.s32.totalorder %s588_s14, %s584_s13 }
   0x9   : > { %p48_p2 = scmp.eq.s32.totalorder %s600_s17, 0  ;;  %p53_p3 = scmp.ne.s32.totalorder %s584_s13, %s580_s12 }
   0xa   : > { %s784_s20 = smov (%p33_p0, %s31_s20), 0  ;;  %p54_p5 = scmp.eq.s32.totalorder %s393_s18, 0 }
   0xb   : > { %p670_p4 = por %p48_p2, %p47_p1  ;;  %s35_s23 = ssub.s32 %s596_s16, %s784_s20 }
   0xc   : > { %p121_p6 = scmp.eq.s32.totalorder %s393_s18, 1  ;;  %p38_p7 = scmp.eq.s32.totalorder %s35_s23, 0 }
   0xd   : > { %p676_p8 = por %p54_p5, %p53_p3  ;;  %p127_p10 = scmp.eq.s32.totalorder %s394_s19, 1 }
   0xe   : > { %p680_p9 = por %p121_p6, %p47_p1  ;;  %p432_p13 = scmp.lt.s32.totalorder %s600_s17, 2 }
   0xf   : > { %s685_s26 = scalar_select %p38_p7, %s588_s14, %s40_s21  }
  0x10   : > { %p687_p11 = por %p127_p10, %p53_p3  ;;  %s153_s28 = sand.u32 1, %s588_s14  }
  0x11   : > { %s397_s29 = sshll.u32 %s153_s28, 4  ;;  %s409_s30 = sshll.u32 %s596_s16, 8 }
  0x12   : > { %s164_s6 = scalar_lea.hbm %s768_s0, %s409_s30  ;;  %s157_s7 = scalar_lea.vmem [#allocation2], %s397_s29 }
  0x13   : > { %s165_s8 = sshll.u32 %s157_s7, 4  ;;  %p700_p0 = pnand %p432_p13, %p670_p4  ;;  %s166_s8 = int_to_ptr.vmem [resolvable:$true] %s165_s8 }
  0x14   : > { %p400_p1 = scmp.ge.s32.totalorder %s600_s17, 1  ;;  %s154_s10 = scalar_lea.sflag [#allocation3], %s153_s28 }
  0x15   : > { %p494_p2 = pneg %p700_p0  ;;  %s505_s11 = scalar_lea.vmem %s166_s8, 256 }
  0x16   : > { %p506_p3 = scmp.ne.s32.totalorder %s166_s8, %s505_s11  ;;  %s602_s18 = smov [#allocation2]  }
  0x17   : > { %s510_s19 = sshll.u32 %s602_s18, 4  ;;  %s511_s19 = int_to_ptr.vmem [resolvable:$false] %s510_s19 }
  0x18   : > { %p508_p5 = pnand %p506_p3, %p494_p2  ;;  %s512_s21 = scalar_lea.vmem %s511_s19, 512 }
  0x19   : > { %p513_p7 = scmp.lt.s32.totalorder %s166_s8, %s511_s19  ;;  %p514_p10 = scmp.lt.s32.totalorder %s512_s21, %s505_s11 }
  0x1a   : > { %p509_p6 = pneg %p508_p5 }
  0x1b   : > { %p515_p12 = por %p514_p10, %p513_p7 }
  0x1d   : > { %p516_p4 = pnand %p515_p12, %p509_p6 }
  0x1f   : > { %519 = shalt.err (!%p516_p4)
}
  0x20   : > { %s603_s22 = smov 128   ;;  %s604_s23 = smov 8  }
  0x21   : > { %427 = dma.hbm_to_vmem [thread:$0]  (!%p700_p0), %s164_s6, 256, %s166_s8, %s154_s10, %s603_s22, %s603_s22, %s604_s23  }
  0x22   : > { %p173_p13 = scmp.lt.s32.totalorder %s600_s17, 3 }
  0x24   : > { %p174_p2 = pnand %p400_p1, %p173_p13 }
  0x25   : > { %s713_s28 = sand.u32 (!%p174_p2), 1, %s584_s13  }
  0x26   : > { %177 = sbr.rel (%p174_p2) target bundleno = 291 (0x123), region = 32  ;;  %s401_s29 = sshll.u32 (!%p174_p2), %s713_s28, 4 }
  0x27   : > { %s180_s30 = scalar_lea.sflag (!%p174_p2), [#allocation3], %s713_s28  ;;  %s183_s4 = scalar_lea.vmem (!%p174_p2), [#allocation2], %s401_s29 }
  0x2b   : > { %571 = dma.done.wait (%p676_p8), %s180_s30, 256  }
  0x2c   : > { %573 = vsyncadd (%p676_p8), %s180_s30, 4294967040  ;;  %v605_v0 = vmov 0.0   ;;  %vm606_vm0 = vmmov 0   ;;  %v607_v1 = vmov 0   ;;  %v208_v2 = vld [vmem:[%s183_s4 + $0x8] sm:$0xff]  ;;  %v207_v3 = vld [vmem:[%s183_s4] sm:$0xff] }
  0x2d   : > { %413 = vmatprep.subr.mxu0 %v605_v0  ;;  %417 = vmatprep.mubr.msk.f32.mxu0 %vm606_vm0, %v605_v0  ;;  %v206_v4 = vld [vmem:[%s769_s1] sm:$0xff]  ;;  %vm215_vm1 = vcmask 130048   ;;  %s402_s24 = sshll.u32 %s713_s28, 3  ;;  %s406_s9 = sshll.u32 %s592_s15, 7 }
  0x2e   : > { %487 = vset.pattern.permute.xlu0 %v607_v1  ;;  %414 = vmatpush3.msra.mxu0 %v208_v2  ;;  %v209_v5 = vld [vmem:[%s770_s2] sm:$0xff]  ;;  %s205_s10 = scalar_lea.vmem [#allocation5], %s402_s24  ;;  %s310_s21 = scalar_lea.hbm %s771_s3, %s406_s9 }
  0x2f   : > { %415 = vmatprep.subr.mxu0 %v605_v0  ;;  %212 = vperm.xlu0 %487, %v209_v5   ;;  %s312_s11 = sshll.u32 %s205_s10, 4  ;;  %s298_s22 = scalar_lea.sflag [#allocation4], %s713_s28  ;;  %s313_s11 = int_to_ptr.vmem [resolvable:$true] %s312_s11 }
  0x30   : > { %416 = vmatpush3.msra.mxu0 %v207_v3  ;;  %s520_s23 = scalar_lea.vmem %s313_s11, 128  ;;  %s608_s29 = smov [#allocation5]  }
  0x31   : > { %418 = vmatmul.mubr.msk.f32.vlgmr.msra.gmra.mxu0 %vm215_vm1, %v206_v4  ;;  %p521_p8 = scmp.ne.s32.totalorder %s313_s11, %s520_s23  ;;  %s524_s30 = sshll.u32 %s608_s29, 4  ;;  %s525_s30 = int_to_ptr.vmem [resolvable:$false] %s524_s30 }
  0x32   : > { %s526_s15 = scalar_lea.vmem %s525_s30, 256  ;;  %p527_p1 = scmp.lt.s32.totalorder %s313_s11, %s525_s30 }
  0x33   : > { %p522_p12 = pnand %p521_p8, %p680_p9  ;;  %p528_p3 = scmp.lt.s32.totalorder %s526_s15, %s520_s23 }
  0x35   : > { %p523_p0 = pneg %p522_p12  ;;  %p529_p5 = por %p528_p3, %p527_p1 }
  0x37   : > { %p530_p6 = pnand %p529_p5, %p523_p0 }
  0xaa   : > { %v213_v6 = vpop.permute.xlu0 %212 }
  0xf1   : > { %v285_v7 = vpop.f32.mrf.mxu0 }
  0xf2   : > { %v286_v8 = vadd.f32 %v285_v7, %v213_v6 }
  0xf3   : > { %v419_v9 = vpop.f32.mrf.mxu0 }
  0xf4   : > { %v404_v10 = vmul.f32 -1.442695, %v286_v8 }
  0xf6   : > { %488 = vpow2.f32 %v404_v10 }
 0x103   : > { %v489_v11 = vpop.eup %488 }
 0x104   : > { %v292_v12 = vadd.f32 1.0, %v489_v11 }
 0x106   : > { %490 = vrcp.f32 %v292_v12 }
 0x113   : > { %v491_v13 = vpop.eup %490 }
 0x114   : > { %v295_v14 = vmul.f32 %v491_v13, %v286_v8 }
 0x116   : > { %296 = vst [vmem:[%s205_s10] sm:$0xff] %v295_v14 }
 0x117   : > { %533 = shalt.err (!%p530_p6)
}
 0x118   : > { %s534_s4 = scalar_lea.hbm %s310_s21, 128  ;;  %s538_s6 = scalar_lea.hbm %s771_s3, 256 }
 0x119   : > { %p535_p7 = scmp.ne.s32.totalorder %s310_s21, %s534_s4  ;;  %p539_p13 = scmp.lt.s32.totalorder %s310_s21, %s771_s3 }
 0x11a   : > { %p540_p2 = scmp.lt.s32.totalorder %s538_s6, %s534_s4 }
 0x11b   : > { %p536_p10 = pnand %p535_p7, %p680_p9 }
 0x11c   : > { %p541_p8 = por %p540_p2, %p539_p13 }
 0x11d   : > { %p537_p4 = pneg %p536_p10 }
 0x11f   : > { %p542_p12 = pnand %p541_p8, %p537_p4 }
 0x121   : > { %545 = shalt.err (!%p542_p12)
}
 0x122   : > { %422 = dma.vmem_to_hbm [thread:$0]  (%p680_p9), %s313_s11, 128, %s310_s21, %s298_s22  }
 0x123 PF: > { %s324_s24 = sand.u32 1, %s580_s12   ;;  %p777_p0 = scmp.ge.s32.totalorder %s600_s17, 2 }
 0x124   : > { %s325_s9 = scalar_lea.sflag [#allocation4], %s324_s24 }
 0x125   : > { %p429_p1 = pnand %p777_p0, %p687_p11 }
 0x127   : > { %p430_p3 = pneg %p429_p1 }
 0x129   : > { %575 = dma.done.wait (%p430_p3), %s325_s9, 128  }
 0x12a   : > { %577 = vsyncadd (%p430_p3), %s325_s9, 4294967168  ;;  %s19_s17 = sadd.s32 1, %s600_s17   ;;  %s778_s12 = smov %s584_s13 }
 0x12b   : > { %p16_p5 = scmp.ge.s32.totalorder %s19_s17, 4   ;;  %s779_s13 = smov %s588_s14 }
 0x12c   : > { %s780_s14 = smov %s685_s26  ;;  %s781_s15 = smov %s596_s16 }
 0x12d   : > { %s782_s16 = smov %s784_s20  ;;  %18 = sbr.rel (!%p16_p5) target bundleno = 6 (0x6), region = 77 }
 0x132   :  { %330 = vsyncpa [#allocation3], 1 }
 0x133   :  { %332 = vsyncpa [#allocation3 + $0x1], 1 }
 0x134   :  { %333 = vsyncpa [#allocation4], 1 }
 0x135   :  { %335 = vsyncpa [#allocation4 + $0x1], 1 }

// kernel: tpu_custom_call.1
= control target key start
LH: loop header
LB: loop body
LE: loop exit
PB: predicated region body
PF: predicated region fallthrough
CT: control target
= control target key end

     0   :  { %8 = vsyncpa [#allocation3], 0  ;;  %s768_s0 = inlined_call_operand.hbm [shape: f32[2,16,128], index: 0, kind: input, shape index: {}]   ;;  %s769_s1 = inlined_call_operand.vmem [shape: f32[8,16], index: 1, kind: input, shape index: {}]   ;;  %s770_s2 = inlined_call_operand.vmem [shape: f32[8,1], index: 2, kind: input, shape index: {}]   ;;  %s771_s3 = inlined_call_operand.hbm [shape: f32[2,8,128], index: 3, kind: output, shape index: {}]  }
   0x1   :  { %10 = vsyncpa [#allocation3 + $0x1], 0 }
   0x2   :  { %11 = vsyncpa [#allocation4], 0 }
   0x3   :  { %13 = vsyncpa [#allocation4 + $0x1], 0  ;;  %s629_s12 = smov 0   ;;  %s631_s13 = smov 0  }
   0x4   :  { %s633_s14 = smov 0   ;;  %s635_s15 = smov 0  }
   0x5   :  { %s637_s16 = smov 0   ;;  %s639_s17 = smov 0  }
   0x6 LB: > { %s393_s18 = sadd.s32 4294967295, %s600_s17   ;;  %s394_s19 = sadd.s32 4294967294, %s600_s17   ;;  %s600_s17 = sphi %s639_s17, %s19_s17   ;;  %s596_s16 = sphi %s637_s16, %s782_s16   ;;  %s592_s15 = sphi %s635_s15, %s781_s15   ;;  %s588_s14 = sphi %s633_s14, %s780_s14   ;;  %s584_s13 = sphi %s631_s13, %s779_s13   ;;  %s580_s12 = sphi %s629_s12, %s778_s12  }
   0x7   : > { %s31_s20 = sadd.s32 1, %s596_s16  ;;  %s40_s21 = sadd.s32 1, %s588_s14 }
   0x8   : > { %p33_p0 = scmp.ge.s32.totalorder %s31_s20, 2  ;;  %p47_p1 = scmp.ne.s32.totalorder %s588_s14, %s584_s13 }
   0x9   : > { %p48_p2 = scmp.eq.s32.totalorder %s600_s17, 0  ;;  %p53_p3 = scmp.ne.s32.totalorder %s584_s13, %s580_s12 }
   0xa   : > { %s784_s20 = smov (%p33_p0, %s31_s20), 0  ;;  %p54_p5 = scmp.eq.s32.totalorder %s393_s18, 0 }
   0xb   : > { %p670_p4 = por %p48_p2, %p47_p1  ;;  %s35_s23 = ssub.s32 %s596_s16, %s784_s20 }
   0xc   : > { %p121_p6 = scmp.eq.s32.totalorder %s393_s18, 1  ;;  %p38_p7 = scmp.eq.s32.totalorder %s35_s23, 0 }
   0xd   : > { %p676_p8 = por %p54_p5, %p53_p3  ;;  %p127_p10 = scmp.eq.s32.totalorder %s394_s19, 1 }
   0xe   : > { %p680_p9 = por %p121_p6, %p47_p1  ;;  %p432_p13 = scmp.lt.s32.totalorder %s600_s17, 2 }
   0xf   : > { %s685_s26 = scalar_select %p38_p7, %s588_s14, %s40_s21  }
  0x10   : > { %p687_p11 = por %p127_p10, %p53_p3  ;;  %s153_s28 = sand.u32 1, %s588_s14  }
  0x11   : > { %s397_s29 = sshll.u32 %s153_s28, 4  ;;  %s409_s30 = sshll.u32 %s596_s16, 8 }
  0x12   : > { %s164_s6 = scalar_lea.hbm %s768_s0, %s409_s30  ;;  %s157_s7 = scalar_lea.vmem [#allocation2], %s397_s29 }
  0x13   : > { %s165_s8 = sshll.u32 %s157_s7, 4  ;;  %p700_p0 = pnand %p432_p13, %p670_p4  ;;  %s166_s8 = int_to_ptr.vmem [resolvable:$true] %s165_s8 }
  0x14   : > { %p400_p1 = scmp.ge.s32.totalorder %s600_s17, 1  ;;  %s154_s10 = scalar_lea.sflag [#allocation3], %s153_s28 }
  0x15   : > { %p494_p2 = pneg %p700_p0  ;;  %s505_s11 = scalar_lea.vmem %s166_s8, 256 }
  0x16   : > { %p506_p3 = scmp.ne.s32.totalorder %s166_s8, %s505_s11  ;;  %s602_s18 = smov [#allocation2]  }
  0x17   : > { %s510_s19 = sshll.u32 %s602_s18, 4  ;;  %s511_s19 = int_to_ptr.vmem [resolvable:$false] %s510_s19 }
  0x18   : > { %p508_p5 = pnand %p506_p3, %p494_p2  ;;  %s512_s21 = scalar_lea.vmem %s511_s19, 512 }
  0x19   : > { %p513_p7 = scmp.lt.s32.totalorder %s166_s8, %s511_s19  ;;  %p514_p10 = scmp.lt.s32.totalorder %s512_s21, %s505_s11 }
  0x1a   : > { %p509_p6 = pneg %p508_p5 }
  0x1b   : > { %p515_p12 = por %p514_p10, %p513_p7 }
  0x1d   : > { %p516_p4 = pnand %p515_p12, %p509_p6 }
  0x1f   : > { %519 = shalt.err (!%p516_p4)
}
  0x20   : > { %s603_s22 = smov 128   ;;  %s604_s23 = smov 8  }
  0x21   : > { %427 = dma.hbm_to_vmem [thread:$0]  (!%p700_p0), %s164_s6, 256, %s166_s8, %s154_s10, %s603_s22, %s603_s22, %s604_s23  }
  0x22   : > { %p173_p13 = scmp.lt.s32.totalorder %s600_s17, 3 }
  0x24   : > { %p174_p2 = pnand %p400_p1, %p173_p13 }
  0x25   : > { %s713_s28 = sand.u32 (!%p174_p2), 1, %s584_s13  }
  0x26   : > { %177 = sbr.rel (%p174_p2) target bundleno = 291 (0x123), region = 32  ;;  %s401_s29 = sshll.u32 (!%p174_p2), %s713_s28, 4 }
  0x27   : > { %s180_s30 = scalar_lea.sflag (!%p174_p2), [#allocation3], %s713_s28  ;;  %s183_s4 = scalar_lea.vmem (!%p174_p2), [#allocation2], %s401_s29 }
  0x2b   : > { %571 = dma.done.wait (%p676_p8), %s180_s30, 256  }
  0x2c   : > { %573 = vsyncadd (%p676_p8), %s180_s30, 4294967040  ;;  %v605_v0 = vmov 0.0   ;;  %vm606_vm0 = vmmov 0   ;;  %v607_v1 = vmov 0   ;;  %v208_v2 = vld [vmem:[%s183_s4 + $0x8] sm:$0xff]  ;;  %v207_v3 = vld [vmem:[%s183_s4] sm:$0xff] }
  0x2d   : > { %413 = vmatprep.subr.mxu0 %v605_v0  ;;  %417 = vmatprep.mubr.msk.f32.mxu0 %vm606_vm0, %v605_v0  ;;  %v206_v4 = vld [vmem:[%s769_s1] sm:$0xff]  ;;  %vm215_vm1 = vcmask 130048   ;;  %s402_s24 = sshll.u32 %s713_s28, 3  ;;  %s406_s9 = sshll.u32 %s592_s15, 7 }
  0x2e   : > { %487 = vset.pattern.permute.xlu0 %v607_v1  ;;  %414 = vmatpush3.msra.mxu0 %v208_v2  ;;  %v209_v5 = vld [vmem:[%s770_s2] sm:$0xff]  ;;  %s205_s10 = scalar_lea.vmem [#allocation5], %s402_s24  ;;  %s310_s21 = scalar_lea.hbm %s771_s3, %s406_s9 }
  0x2f   : > { %415 = vmatprep.subr.mxu0 %v605_v0  ;;  %212 = vperm.xlu0 %487, %v209_v5   ;;  %s312_s11 = sshll.u32 %s205_s10, 4  ;;  %s298_s22 = scalar_lea.sflag [#allocation4], %s713_s28  ;;  %s313_s11 = int_to_ptr.vmem [resolvable:$true] %s312_s11 }
  0x30   : > { %416 = vmatpush3.msra.mxu0 %v207_v3  ;;  %s520_s23 = scalar_lea.vmem %s313_s11, 128  ;;  %s608_s29 = smov [#allocation5]  }
  0x31   : > { %418 = vmatmul.mubr.msk.f32.vlgmr.msra.gmra.mxu0 %vm215_vm1, %v206_v4  ;;  %p521_p8 = scmp.ne.s32.totalorder %s313_s11, %s520_s23  ;;  %s524_s30 = sshll.u32 %s608_s29, 4  ;;  %s525_s30 = int_to_ptr.vmem [resolvable:$false] %s524_s30 }
  0x32   : > { %s526_s15 = scalar_lea.vmem %s525_s30, 256  ;;  %p527_p1 = scmp.lt.s32.totalorder %s313_s11, %s525_s30 }
  0x33   : > { %p522_p12 = pnand %p521_p8, %p680_p9  ;;  %p528_p3 = scmp.lt.s32.totalorder %s526_s15, %s520_s23 }
  0x35   : > { %p523_p0 = pneg %p522_p12  ;;  %p529_p5 = por %p528_p3, %p527_p1 }
  0x37   : > { %p530_p6 = pnand %p529_p5, %p523_p0 }
  0xaa   : > { %v213_v6 = vpop.permute.xlu0 %212 }
  0xf1   : > { %v285_v7 = vpop.f32.mrf.mxu0 }
  0xf2   : > { %v286_v8 = vadd.f32 %v285_v7, %v213_v6 }
  0xf3   : > { %v419_v9 = vpop.f32.mrf.mxu0 }
  0xf4   : > { %v404_v10 = vmul.f32 -1.442695, %v286_v8 }
  0xf6   : > { %488 = vpow2.f32 %v404_v10 }
 0x103   : > { %v489_v11 = vpop.eup %488 }
 0x104   : > { %v292_v12 = vadd.f32 1.0, %v489_v11 }
 0x106   : > { %490 = vrcp.f32 %v292_v12 }
 0x113   : > { %v491_v13 = vpop.eup %490 }
 0x114   : > { %v295_v14 = vmul.f32 %v491_v13, %v286_v8 }
 0x116   : > { %296 = vst [vmem:[%s205_s10] sm:$0xff] %v295_v14 }
 0x117   : > { %533 = shalt.err (!%p530_p6)
}
 0x118   : > { %s534_s4 = scalar_lea.hbm %s310_s21, 128  ;;  %s538_s6 = scalar_lea.hbm %s771_s3, 256 }
 0x119   : > { %p535_p7 = scmp.ne.s32.totalorder %s310_s21, %s534_s4  ;;  %p539_p13 = scmp.lt.s32.totalorder %s310_s21, %s771_s3 }
 0x11a   : > { %p540_p2 = scmp.lt.s32.totalorder %s538_s6, %s534_s4 }
 0x11b   : > { %p536_p10 = pnand %p535_p7, %p680_p9 }
 0x11c   : > { %p541_p8 = por %p540_p2, %p539_p13 }
 0x11d   : > { %p537_p4 = pneg %p536_p10 }
 0x11f   : > { %p542_p12 = pnand %p541_p8, %p537_p4 }
 0x121   : > { %545 = shalt.err (!%p542_p12)
}
 0x122   : > { %422 = dma.vmem_to_hbm [thread:$0]  (%p680_p9), %s313_s11, 128, %s310_s21, %s298_s22  }
 0x123 PF: > { %s324_s24 = sand.u32 1, %s580_s12   ;;  %p777_p0 = scmp.ge.s32.totalorder %s600_s17, 2 }
 0x124   : > { %s325_s9 = scalar_lea.sflag [#allocation4], %s324_s24 }
 0x125   : > { %p429_p1 = pnand %p777_p0, %p687_p11 }
 0x127   : > { %p430_p3 = pneg %p429_p1 }
 0x129   : > { %575 = dma.done.wait (%p430_p3), %s325_s9, 128  }
 0x12a   : > { %577 = vsyncadd (%p430_p3), %s325_s9, 4294967168  ;;  %s19_s17 = sadd.s32 1, %s600_s17   ;;  %s778_s12 = smov %s584_s13 }
 0x12b   : > { %p16_p5 = scmp.ge.s32.totalorder %s19_s17, 4   ;;  %s779_s13 = smov %s588_s14 }
 0x12c   : > { %s780_s14 = smov %s685_s26  ;;  %s781_s15 = smov %s596_s16 }
 0x12d   : > { %s782_s16 = smov %s784_s20  ;;  %18 = sbr.rel (!%p16_p5) target bundleno = 6 (0x6), region = 77 }
 0x132   :  { %330 = vsyncpa [#allocation3], 1 }
 0x133   :  { %332 = vsyncpa [#allocation3 + $0x1], 1 }
 0x134   :  { %333 = vsyncpa [#allocation4], 1 }
 0x135   :  { %335 = vsyncpa [#allocation4 + $0x1], 1 }

</bundles_post_ra>
